<compile_context>
chip_gen: v6e
topology: v6e:2x2x1
jax: 0.10.0
libtpu: 0.0.40
codegen_flags: <defaults>
</compile_context>

<pallas_src>
import math
from functools import partial

import jax
import jax.numpy as jnp
from jax.experimental import pallas as pl
from jax.experimental.pallas import tpu as pltpu


def _decoder_kernel(n_ref, zr_ref, zc_ref, w_ref, out_ref, zw_ref, *, logit_t: float):
    tm, tn = out_ref.shape
    n = n_ref[0]                                   # actual_nodes (SMEM scalar)
    i = pl.program_id(0)
    j = pl.program_id(1)
    row_start = i * tm
    col_start = j * tn
    tile_live = jnp.logical_and(row_start < n, col_start < n)

    # zw = z_rows @ W, computed once per row block (j == 0) and reused for
    # every column tile of the same row block (column axis is "arbitrary",
    # so j runs sequentially on a core and the scratch persists).
    @pl.when(jnp.logical_and(tile_live, j == 0))
    def _():
        zw_ref[...] = jnp.dot(
            zr_ref[...], w_ref[...], preferred_element_type=jnp.float32
        )

    @pl.when(tile_live)
    def _():
        logits = jax.lax.dot_general(              # MXU, contracts last dims => no z.T copy
            zw_ref[...], zc_ref[...],
            dimension_numbers=(((1,), (1,)), ((), ())),
            preferred_element_type=jnp.float32,
        )                                          # (tm, tn)
        row_ok = (row_start + jax.lax.broadcasted_iota(jnp.int32, (tm, 1), 0)) < n
        col_ok = (col_start + jax.lax.broadcasted_iota(jnp.int32, (1, tn), 1)) < n
        out_ref[...] = (row_ok & col_ok & (logits > logit_t)).astype(jnp.float32)

    @pl.when(jnp.logical_not(tile_live))
    def _():
        out_ref[...] = jnp.zeros_like(out_ref)


def _round_up(x: int, m: int) -> int:
    return ((x + m - 1) // m) * m


def _pick_tile(n_pad: int, cap: int = 512) -> int:
    # n_pad is a multiple of 128; pick the largest tile <= cap dividing n_pad.
    t = min(cap, n_pad)
    while n_pad % t:
        t //= 2
    return t


def bilinear_edge_decoder(z, weight, max_nodes: int, threshold: float = 0.5):
    """z: (actual_nodes, input_dim) f32; weight: (input_dim, input_dim) f32.
    Returns (max_nodes, max_nodes) f32 binary adjacency, zero-padded."""
    actual_nodes, input_dim = z.shape
    assert weight.shape == (input_dim, input_dim)
    assert actual_nodes <= max_nodes
    assert 0.0 < threshold < 1.0

    # sigmoid(x) > t  <=>  x > logit(t); computed once at trace time.
    logit_t = math.log(threshold / (1.0 - threshold))

    # Lane-dense internal output size (multiple of 128); slice back at the end.
    n_pad = max(_round_up(max_nodes, 128), 128)
    tile = _pick_tile(n_pad)

    z_padded = (
        jnp.zeros((n_pad, input_dim), jnp.float32)
        .at[:actual_nodes]
        .set(z.astype(jnp.float32))
    )
    w = weight.astype(jnp.float32)
    n_arr = jnp.array([actual_nodes], dtype=jnp.int32)

    grid = (n_pad // tile, n_pad // tile)
    kernel = partial(_decoder_kernel, logit_t=logit_t)

    cost = pl.CostEstimate(
        flops=2 * n_pad * input_dim * input_dim + 2 * n_pad * n_pad * input_dim,
        transcendentals=0,
        bytes_accessed=4 * (2 * n_pad * input_dim + input_dim * input_dim + n_pad * n_pad),
    )

    out_padded = pl.pallas_call(
        kernel,
        out_shape=jax.ShapeDtypeStruct((n_pad, n_pad), jnp.float32),
        grid_spec=pltpu.PrefetchScalarGridSpec(
            num_scalar_prefetch=1,
            grid=grid,
            in_specs=[
                pl.BlockSpec((tile, input_dim), lambda i, j, n: (i, 0)),        # z row block
                pl.BlockSpec((tile, input_dim), lambda i, j, n: (j, 0)),        # z col block
                pl.BlockSpec((input_dim, input_dim), lambda i, j, n: (0, 0)),   # W (resident)
            ],
            out_specs=pl.BlockSpec((tile, tile), lambda i, j, n: (i, j)),
            scratch_shapes=[pltpu.VMEM((tile, input_dim), jnp.float32)],        # cached zw
        ),
        compiler_params=pltpu.CompilerParams(
            dimension_semantics=("parallel", "arbitrary"),
        ),
        cost_estimate=cost,
    )(n_arr, z_padded, z_padded, w)

    return out_padded[:max_nodes, :max_nodes]


def xavier_uniform(key, shape, gain=0.01):
    fan_in, fan_out = shape[0], shape[1]
    bound = gain * jnp.sqrt(6.0 / (fan_in + fan_out))
    return jax.random.uniform(key, shape, jnp.float32, minval=-bound, maxval=bound)


if __name__ == "__main__":
    key = jax.random.PRNGKey(0)
    k_w, k_z = jax.random.split(key)

    input_dim = 32
    max_nodes = 16
    actual_nodes = 12
    threshold = 0.5

    # Deterministic parameter init (matches nn.init.xavier_uniform_(gain=0.01)).
    weight = xavier_uniform(k_w, (input_dim, input_dim), gain=0.01)
    z = jax.random.normal(k_z, (actual_nodes, input_dim), jnp.float32)

    out = jax.block_until_ready(bilinear_edge_decoder(z, weight, max_nodes, threshold))

    # Reference (PyTorch semantics) in plain JAX.
    sig = jax.nn.sigmoid(z @ weight @ z.T)
    adj_bin = (sig > threshold).astype(jnp.float32)
    ref = (
        jnp.zeros((max_nodes, max_nodes), jnp.float32)
        .at[:actual_nodes, :actual_nodes]
        .set(adj_bin)
    )
    # The kernel thresholds in logit space; allow flips only where sigmoid sits
    # within float rounding of the threshold (mathematically equivalent otherwise).
    border = (
        jnp.zeros((max_nodes, max_nodes), dtype=bool)
        .at[:actual_nodes, :actual_nodes]
        .set(jnp.abs(sig - threshold) < 1e-6)
    )

    assert out.shape == (max_nodes, max_nodes)
    assert bool(jnp.all((out == ref) | border)), "mismatch vs reference"

    print("KERNEL_OK")
</pallas_src>

<mosaic_0001>
module attributes {stable_mosaic.version = 11 : i64} {
  func.func @_decoder_kernel(%arg0: i32, %arg1: i32, %arg2: memref<1xi32, #tpu.memory_space<smem>>, %arg3: memref<128x32xf32, #tpu.memory_space<vmem>>, %arg4: memref<128x32xf32, #tpu.memory_space<vmem>>, %arg5: memref<32x32xf32, #tpu.memory_space<vmem>>, %arg6: memref<128x128xf32, #tpu.memory_space<vmem>>, %arg7: memref<128x32xf32, #tpu.memory_space<vmem>>) attributes {dimension_semantics = [#tpu.dimension_semantics<parallel>, #tpu.dimension_semantics<arbitrary>], iteration_bounds = array<i64: 1, 1>, scalar_prefetch = 1 : i64, scratch_operands = 1 : i64, tpu.core_type = #tpu.core_type<tc>, window_params = [{transform_indices = @transform_0, window_bounds = array<i64: 128, 32>}, {transform_indices = @transform_1, window_bounds = array<i64: 128, 32>}, {pipeline_mode = #tpu.pipeline_mode<synchronous>, transform_indices = @transform_2, window_bounds = array<i64: 32, 32>}, {transform_indices = @transform_3, window_bounds = array<i64: 128, 128>}]} {
    %c0 = arith.constant 0 : index
    %0 = memref.load %arg2[%c0] : memref<1xi32, #tpu.memory_space<smem>>
    %c128_i32 = arith.constant 128 : i32
    %1 = arith.muli %arg0, %c128_i32 : i32
    %c128_i32_0 = arith.constant 128 : i32
    %2 = arith.muli %arg1, %c128_i32_0 : i32
    %3 = arith.cmpi slt, %1, %0 : i32
    %4 = arith.cmpi slt, %2, %0 : i32
    %5 = arith.andi %3, %4 : i1
    %c0_i32 = arith.constant 0 : i32
    %6 = arith.cmpi eq, %arg1, %c0_i32 : i32
    %7 = arith.andi %5, %6 : i1
    %8 = arith.extui %7 : i1 to i32
    %c0_i32_1 = arith.constant 0 : i32
    %9 = arith.cmpi ne, %8, %c0_i32_1 : i32
    scf.if %9 {
      %c0_4 = arith.constant 0 : index
      %c0_5 = arith.constant 0 : index
      %15 = vector.load %arg3[%c0_4, %c0_5] : memref<128x32xf32, #tpu.memory_space<vmem>>, vector<128x32xf32>
      %c0_6 = arith.constant 0 : index
      %c0_7 = arith.constant 0 : index
      %16 = vector.load %arg5[%c0_6, %c0_7] : memref<32x32xf32, #tpu.memory_space<vmem>>, vector<32x32xf32>
      %cst = arith.constant dense<0.000000e+00> : vector<128x32xf32>
      %17 = tpu.matmul %15, %16, %cst {dimension_numbers = #tpu.dot_dimension_numbers<[1], [0], [0], [1], [0, 0, 1, 1], [], []>} : vector<128x32xf32>, vector<32x32xf32>, vector<128x32xf32> -> vector<128x32xf32>
      %c0_8 = arith.constant 0 : index
      %c0_9 = arith.constant 0 : index
      %18 = vector.load %arg7[%c0_8, %c0_9] : memref<128x32xf32, #tpu.memory_space<vmem>>, vector<128x32xf32>
      tpu.vector_store %arg7[%c0_8, %c0_9], %17 {strides = array<i32>} : memref<128x32xf32, #tpu.memory_space<vmem>>, vector<128x32xf32>,
    } else {
    }
    %10 = arith.extui %5 : i1 to i32
    %c0_i32_2 = arith.constant 0 : i32
    %11 = arith.cmpi ne, %10, %c0_i32_2 : i32
    scf.if %11 {
      %c0_4 = arith.constant 0 : index
      %c0_5 = arith.constant 0 : index
      %15 = vector.load %arg7[%c0_4, %c0_5] : memref<128x32xf32, #tpu.memory_space<vmem>>, vector<128x32xf32>
      %c0_6 = arith.constant 0 : index
      %c0_7 = arith.constant 0 : index
      %16 = vector.load %arg4[%c0_6, %c0_7] : memref<128x32xf32, #tpu.memory_space<vmem>>, vector<128x32xf32>
      %cst = arith.constant dense<0.000000e+00> : vector<128x128xf32>
      %17 = tpu.matmul %15, %16, %cst {dimension_numbers = #tpu.dot_dimension_numbers<[1], [1], [0], [0], [0, 0, 1, 0], [], []>} : vector<128x32xf32>, vector<128x32xf32>, vector<128x128xf32> -> vector<128x128xf32>
      %18 = tpu.iota {dimensions = array<i32: 0>} : vector<128x1xi32>
      %19 = vector.broadcast %1 : i32 to vector<128x1xi32>
      %20 = arith.addi %19, %18 : vector<128x1xi32>
      %21 = vector.broadcast %0 : i32 to vector<128x1xi32>
      %22 = arith.cmpi slt, %20, %21 : vector<128x1xi32>
      %23 = tpu.iota {dimensions = array<i32: 1>} : vector<1x128xi32>
      %24 = vector.broadcast %2 : i32 to vector<1x128xi32>
      %25 = arith.addi %24, %23 : vector<1x128xi32>
      %26 = vector.broadcast %0 : i32 to vector<1x128xi32>
      %27 = arith.cmpi slt, %25, %26 : vector<1x128xi32>
      %28 = vector.broadcast %22 : vector<128x1xi1> to vector<128x128xi1>
      %29 = vector.broadcast %27 : vector<1x128xi1> to vector<128x128xi1>
      %30 = arith.andi %28, %29 : vector<128x128xi1>
      %cst_8 = arith.constant 0.000000e+00 : f32
      %31 = vector.broadcast %cst_8 : f32 to vector<128x128xf32>
      %32 = arith.cmpf ogt, %17, %31 : vector<128x128xf32>
      %33 = arith.andi %30, %32 : vector<128x128xi1>
      %34 = arith.extui %33 : vector<128x128xi1> to vector<128x128xi32>
      %35 = arith.sitofp %34 : vector<128x128xi32> to vector<128x128xf32>
      %c0_9 = arith.constant 0 : index
      %c0_10 = arith.constant 0 : index
      %36 = vector.load %arg6[%c0_9, %c0_10] : memref<128x128xf32, #tpu.memory_space<vmem>>, vector<128x128xf32>
      tpu.vector_store %arg6[%c0_9, %c0_10], %35 {strides = array<i32>} : memref<128x128xf32, #tpu.memory_space<vmem>>, vector<128x128xf32>,
    } else {
    }
    %true = arith.constant true
    %12 = arith.xori %5, %true : i1
    %13 = arith.extui %12 : i1 to i32
    %c0_i32_3 = arith.constant 0 : i32
    %14 = arith.cmpi ne, %13, %c0_i32_3 : i32
    scf.if %14 {
      %cst = arith.constant 0.000000e+00 : f32
      %15 = vector.broadcast %cst : f32 to vector<128x128xf32>
      %c0_4 = arith.constant 0 : index
      %c0_5 = arith.constant 0 : index
      %16 = vector.load %arg6[%c0_4, %c0_5] : memref<128x128xf32, #tpu.memory_space<vmem>>, vector<128x128xf32>
      tpu.vector_store %arg6[%c0_4, %c0_5], %15 {strides = array<i32>} : memref<128x128xf32, #tpu.memory_space<vmem>>, vector<128x128xf32>,
    } else {
    }
    return
  }
  func.func @transform_0(%arg0: i32, %arg1: i32, %arg2: memref<1xi32, #tpu.memory_space<smem>>) -> (i32, i32) {
    %c0_i32 = arith.constant 0 : i32
    %c0_i32_0 = arith.constant 0 : i32
    return %arg0, %c0_i32 : i32, i32
  }
  func.func @transform_1(%arg0: i32, %arg1: i32, %arg2: memref<1xi32, #tpu.memory_space<smem>>) -> (i32, i32) {
    %c0_i32 = arith.constant 0 : i32
    %c0_i32_0 = arith.constant 0 : i32
    return %arg1, %c0_i32 : i32, i32
  }
  func.func @transform_2(%arg0: i32, %arg1: i32, %arg2: memref<1xi32, #tpu.memory_space<smem>>) -> (i32, i32) {
    %c0_i32 = arith.constant 0 : i32
    %c0_i32_0 = arith.constant 0 : i32
    %c0_i32_1 = arith.constant 0 : i32
    return %c0_i32, %c0_i32_0 : i32, i32
  }
  func.func @transform_3(%arg0: i32, %arg1: i32, %arg2: memref<1xi32, #tpu.memory_space<smem>>) -> (i32, i32) {
    %c0_i32 = arith.constant 0 : i32
    return %arg0, %arg1 : i32, i32
  }
}

</mosaic_0001>

<bundles_post_ra>
// kernel: tpu_custom_call.1
= control target key start
LH: loop header
LB: loop body
LE: loop exit
PB: predicated region body
PF: predicated region fallthrough
CT: control target
= control target key end

     0   :  { %10 = vsyncpa [#allocation6], 0  ;;  %s1474_s0 = inlined_call_operand.<no memory space> [shape: s32[1], index: 0, kind: input, shape index: {}]   ;;  %s1475_s1 = inlined_call_operand.vmem [shape: f32[128,32], index: 1, kind: input, shape index: {}]   ;;  %s1476_s2 = inlined_call_operand.vmem [shape: f32[128,32], index: 2, kind: input, shape index: {}]   ;;  %s1477_s3 = inlined_call_operand.vmem [shape: f32[32,32], index: 3, kind: input, shape index: {}]   ;;  %s1478_s4 = inlined_call_operand.hbm [shape: f32[128,128], index: 4, kind: output, shape index: {}]  }
   0x1   :  { %p756_p0 = scmp.gt.s32.totalorder %s1474_s0, 0 }
   0x3   :  { %p1063_p1 = pnand %p756_p0, %p756_p0 }
   0x5   :  { %28 = sbr.rel (%p1063_p1) target bundleno = 228 (0xe4), region = 17 }
   0xa   :  { %v48_v0 = vld [vmem:[%s1477_s3 + $0x18] sm:$0xff]  ;;  %v47_v1 = vld [vmem:[%s1477_s3 + $0x10] sm:$0xff]  ;;  %v46_v2 = vld [vmem:[%s1477_s3 + $0x8] sm:$0xff]  ;;  %vm49_vm0 = vcmask 261120  }
   0xb   :  { %875 = vmatprep.subr.mxu0 %v48_v0  ;;  %963 = vmatprep.subr.mxu1 %v48_v0  ;;  %v45_v3 = vld [vmem:[%s1477_s3] sm:$0xff]  ;;  %v30_v6 = vld [vmem:[%s1475_s1 + $0x8] sm:$0xff]  ;;  %v31_v8 = vld [vmem:[%s1475_s1 + $0x10] sm:$0xff] }
   0xc   :  { %876 = vmatpush3.msra.mxu0 %v48_v0  ;;  %967 = vmatpush3.msra.mxu1 %v48_v0  ;;  %v29_v4 = vld [vmem:[%s1475_s1] sm:$0xff]  ;;  %v38_v7 = vld [vmem:[%s1475_s1 + $0x48] sm:$0xff]  ;;  %v39_v9 = vld [vmem:[%s1475_s1 + $0x50] sm:$0xff] }
   0xd   :  { %877 = vmatprep.subr.mxu0 %v47_v1  ;;  %964 = vmatprep.subr.mxu1 %v47_v1  ;;  %v37_v5 = vld [vmem:[%s1475_s1 + $0x40] sm:$0xff]  ;;  %v32_v10 = vld [vmem:[%s1475_s1 + $0x18] sm:$0xff]  ;;  %v34_v14 = vld [vmem:[%s1475_s1 + $0x28] sm:$0xff] }
   0xe   :  { %878 = vmatpush3.msra.mxu0 %v47_v1  ;;  %968 = vmatpush3.msra.mxu1 %v47_v1  ;;  %v40_v11 = vld [vmem:[%s1475_s1 + $0x58] sm:$0xff]  ;;  %v33_v12 = vld [vmem:[%s1475_s1 + $0x20] sm:$0xff]  ;;  %v42_v15 = vld [vmem:[%s1475_s1 + $0x68] sm:$0xff] }
   0xf   :  { %879 = vmatprep.subr.mxu0 %v46_v2  ;;  %965 = vmatprep.subr.mxu1 %v46_v2  ;;  %v41_v13 = vld [vmem:[%s1475_s1 + $0x60] sm:$0xff]  ;;  %v35_v16 = vld [vmem:[%s1475_s1 + $0x30] sm:$0xff]  ;;  %v36_v18 = vld [vmem:[%s1475_s1 + $0x38] sm:$0xff] }
  0x10   :  { %880 = vmatpush3.msra.mxu0 %v46_v2  ;;  %969 = vmatpush3.msra.mxu1 %v46_v2  ;;  %v43_v17 = vld [vmem:[%s1475_s1 + $0x70] sm:$0xff]  ;;  %v44_v19 = vld [vmem:[%s1475_s1 + $0x78] sm:$0xff] }
  0x11   :  { %881 = vmatprep.subr.mxu0 %v45_v3  ;;  %966 = vmatprep.subr.mxu1 %v45_v3 }
  0x12   :  { %882 = vmatpush3.msra.mxu0 %v45_v3  ;;  %970 = vmatpush3.msra.mxu1 %v45_v3 }
  0x13   :  { %883 = vmatprep.mubr.msk.f32.mxu0 %vm49_vm0, %v29_v4  ;;  %895 = vmatprep.mubr.msk.f32.mxu1 %vm49_vm0, %v37_v5 }
  0x14   :  { %884 = vmatmul.mubr.msk.f32.vlgmr.msra.gmra.mxu0 %vm49_vm0, %v30_v6  ;;  %896 = vmatmul.mubr.msk.f32.vlgmr.msra.gmra.mxu1 %vm49_vm0, %v38_v7 }
  0x15   :  { %886 = vmatprep.mubr.msk.f32.mxu0 %vm49_vm0, %v31_v8  ;;  %898 = vmatprep.mubr.msk.f32.mxu1 %vm49_vm0, %v39_v9 }
  0x18   :  { %887 = vmatmul.mubr.msk.f32.gmra.mxu0 %vm49_vm0, %v32_v10  ;;  %899 = vmatmul.mubr.msk.f32.gmra.mxu1 %vm49_vm0, %v40_v11 }
  0x19   :  { %889 = vmatprep.mubr.msk.f32.mxu0 %vm49_vm0, %v33_v12  ;;  %901 = vmatprep.mubr.msk.f32.mxu1 %vm49_vm0, %v41_v13 }
  0x1c   :  { %890 = vmatmul.mubr.msk.f32.gmra.mxu0 %vm49_vm0, %v34_v14  ;;  %902 = vmatmul.mubr.msk.f32.gmra.mxu1 %vm49_vm0, %v42_v15 }
  0x1d   :  { %892 = vmatprep.mubr.msk.f32.mxu0 %vm49_vm0, %v35_v16  ;;  %904 = vmatprep.mubr.msk.f32.mxu1 %vm49_vm0, %v43_v17 }
  0x20   :  { %893 = vmatmul.mubr.msk.f32.gmra.mxu0 %vm49_vm0, %v36_v18  ;;  %905 = vmatmul.mubr.msk.f32.gmra.mxu1 %vm49_vm0, %v44_v19 }
  0xd4   :  { %v885_v20 = vpop.f32.mrf.mxu0  ;;  %v897_v21 = vpop.f32.mrf.mxu1 }
  0xd5   :  { %244 = vst.msk [vmem:[#allocation2 + $0x8] sm:$0xff] %vm49_vm0, %v885_v20  ;;  %252 = vst.msk [vmem:[#allocation2 + $0x48] sm:$0xff] %vm49_vm0, %v897_v21 }
  0xd6   :  { %v164_v22 = vpop.f32.mrf.mxu0  ;;  %v204_v23 = vpop.f32.mrf.mxu1 }
  0xd7   :  { %243 = vst.msk [vmem:[#allocation2] sm:$0xff] %vm49_vm0, %v164_v22  ;;  %251 = vst.msk [vmem:[#allocation2 + $0x40] sm:$0xff] %vm49_vm0, %v204_v23 }
  0xd8   :  { %v888_v24 = vpop.f32.mrf.mxu0  ;;  %v900_v25 = vpop.f32.mrf.mxu1 }
  0xd9   :  { %246 = vst.msk [vmem:[#allocation2 + $0x18] sm:$0xff] %vm49_vm0, %v888_v24  ;;  %254 = vst.msk [vmem:[#allocation2 + $0x58] sm:$0xff] %vm49_vm0, %v900_v25 }
  0xda   :  { %v174_v26 = vpop.f32.mrf.mxu0  ;;  %v214_v27 = vpop.f32.mrf.mxu1 }
  0xdb   :  { %245 = vst.msk [vmem:[#allocation2 + $0x10] sm:$0xff] %vm49_vm0, %v174_v26  ;;  %253 = vst.msk [vmem:[#allocation2 + $0x50] sm:$0xff] %vm49_vm0, %v214_v27 }
  0xdc   :  { %v891_v28 = vpop.f32.mrf.mxu0  ;;  %v903_v29 = vpop.f32.mrf.mxu1 }
  0xdd   :  { %248 = vst.msk [vmem:[#allocation2 + $0x28] sm:$0xff] %vm49_vm0, %v891_v28  ;;  %256 = vst.msk [vmem:[#allocation2 + $0x68] sm:$0xff] %vm49_vm0, %v903_v29 }
  0xde   :  { %v184_v30 = vpop.f32.mrf.mxu0  ;;  %v224_v31 = vpop.f32.mrf.mxu1 }
  0xdf   :  { %247 = vst.msk [vmem:[#allocation2 + $0x20] sm:$0xff] %vm49_vm0, %v184_v30  ;;  %255 = vst.msk [vmem:[#allocation2 + $0x60] sm:$0xff] %vm49_vm0, %v224_v31 }
  0xe0   :  { %v894_v32 = vpop.f32.mrf.mxu0  ;;  %v906_v33 = vpop.f32.mrf.mxu1 }
  0xe1   :  { %250 = vst.msk [vmem:[#allocation2 + $0x38] sm:$0xff] %vm49_vm0, %v894_v32  ;;  %258 = vst.msk [vmem:[#allocation2 + $0x78] sm:$0xff] %vm49_vm0, %v906_v33 }
  0xe2   :  { %v194_v34 = vpop.f32.mrf.mxu0  ;;  %v234_v35 = vpop.f32.mrf.mxu1 }
  0xe3   :  { %249 = vst.msk [vmem:[#allocation2 + $0x30] sm:$0xff] %vm49_vm0, %v194_v34  ;;  %257 = vst.msk [vmem:[#allocation2 + $0x70] sm:$0xff] %vm49_vm0, %v234_v35 }
  0xe4 PF:  { %260 = sbr.rel (%p1063_p1) target bundleno = 514 (0x202), region = 21 }
  0xe9   :  { %v292_v36 = vld [vmem:[%s1476_s2 + $0x78] sm:$0xff]  ;;  %vm293_vm1 = vcmask 261120   ;;  %v291_v37 = vld [vmem:[%s1476_s2 + $0x70] sm:$0xff]  ;;  %v290_v38 = vld [vmem:[%s1476_s2 + $0x68] sm:$0xff]  ;;  %v535_v4 = vlaneseq  ;;  %v1294_v8 = vstv %s1474_s0  ;;  %v1492_v25 = vmov 0 }
  0xea   :  { %907 = vmatprep.subr.msk.mxu0 %vm293_vm1, %v292_v36  ;;  %971 = vmatprep.subr.msk.mxu1 %vm293_vm1, %v292_v36  ;;  %v261_v39 = vld [vmem:[#allocation2] sm:$0xff]  ;;  %v288_v42 = vld [vmem:[%s1476_s2 + $0x58] sm:$0xff]  ;;  %v287_v43 = vld [vmem:[%s1476_s2 + $0x50] sm:$0xff]  ;;  %v1494_v27 = vmov 0  ;;  %v1496_v29 = vmov 0  ;;  %v1498_v31 = vmov 0 }
  0xeb   :  { %908 = vmatpush3.xpose.msk.msra.mxu0 %vm293_vm1, %v292_v36  ;;  %987 = vmatpush3.xpose.msk.msra.mxu1 %vm293_vm1, %v292_v36  ;;  %v269_v40 = vld [vmem:[#allocation2 + $0x40] sm:$0xff]  ;;  %v286_v44 = vld [vmem:[%s1476_s2 + $0x48] sm:$0xff]  ;;  %v284_v46 = vld [vmem:[%s1476_s2 + $0x38] sm:$0xff]  ;;  %v536_v5 = vshrl.u32 %v535_v4, 7  ;;  %v587_v7 = vand.u32 127, %v535_v4  ;;  %v1502_v36 = vmov 0 }
  0xec   :  { %909 = vmatprep.subr.msk.mxu0 %vm293_vm1, %v291_v37  ;;  %972 = vmatprep.subr.msk.mxu1 %vm293_vm1, %v291_v37  ;;  %v289_v41 = vld [vmem:[%s1476_s2 + $0x60] sm:$0xff]  ;;  %v283_v47 = vld [vmem:[%s1476_s2 + $0x30] sm:$0xff]  ;;  %v282_v48 = vld [vmem:[%s1476_s2 + $0x28] sm:$0xff] }
  0xed   :  { %939 = vmatprep.mubr.msk.f32.mxu0 %vm293_vm1, %v261_v39  ;;  %951 = vmatprep.mubr.msk.f32.mxu1 %vm293_vm1, %v269_v40  ;;  %v285_v45 = vld [vmem:[%s1476_s2 + $0x40] sm:$0xff]  ;;  %v280_v50 = vld [vmem:[%s1476_s2 + $0x18] sm:$0xff]  ;;  %v279_v51 = vld [vmem:[%s1476_s2 + $0x10] sm:$0xff]  ;;  %v537_v6 = vadd.s32 8, %v536_v5  ;;  %v545_v9 = vadd.s32 72, %v536_v5  ;;  %v544_v10 = vadd.s32 64, %v536_v5  ;;  %vm1298_vm3 = vcmp.lt.s32.totalorder %v587_v7, %v1294_v8 }
  0xee   :  { %v281_v49 = vld [vmem:[%s1476_s2 + $0x20] sm:$0xff]  ;;  %v278_v52 = vld [vmem:[%s1476_s2 + $0x8] sm:$0xff]  ;;  %v263_v56 = vld [vmem:[#allocation2 + $0x10] sm:$0xff]  ;;  %v539_v12 = vadd.s32 24, %v536_v5  ;;  %v547_v13 = vadd.s32 88, %v536_v5  ;;  %vm570_vm5 = vcmp.lt.s32.totalorder %v536_v5, %v1294_v8  ;;  %v538_v14 = vadd.s32 16, %v536_v5 }
  0xef   :  { %910 = vmatpush3.xpose.msk.msra.mxu0 %vm293_vm1, %v291_v37  ;;  %988 = vmatpush3.xpose.msk.msra.mxu1 %vm293_vm1, %v291_v37  ;;  %v277_v53 = vld [vmem:[%s1476_s2] sm:$0xff]  ;;  %v262_v54 = vld [vmem:[#allocation2 + $0x8] sm:$0xff]  ;;  %v271_v57 = vld [vmem:[#allocation2 + $0x50] sm:$0xff]  ;;  %vm571_vm2 = vcmp.lt.s32.totalorder %v537_v6, %v1294_v8  ;;  %vm579_vm4 = vcmp.lt.s32.totalorder %v545_v9, %v1294_v8  ;;  %vm578_vm7 = vcmp.lt.s32.totalorder %v544_v10, %v1294_v8  ;;  %v546_v16 = vadd.s32 80, %v536_v5 }
  0xf0   :  { %911 = vmatprep.subr.msk.mxu0 %vm293_vm1, %v290_v38  ;;  %973 = vmatprep.subr.msk.mxu1 %vm293_vm1, %v290_v38  ;;  %v270_v55 = vld [vmem:[#allocation2 + $0x48] sm:$0xff]  ;;  %v264_v58 = vld [vmem:[#allocation2 + $0x18] sm:$0xff]  ;;  %v265_v60 = vld [vmem:[#allocation2 + $0x20] sm:$0xff]  ;;  %vm573_vm9 = vcmp.lt.s32.totalorder %v539_v12, %v1294_v8  ;;  %v541_v18 = vadd.s32 40, %v536_v5  ;;  %vm581_vm11 = vcmp.lt.s32.totalorder %v547_v13, %v1294_v8  ;;  %v549_v20 = vadd.s32 104, %v536_v5 }
  0xf1   :  { %v272_v59 = vld [vmem:[#allocation2 + $0x58] sm:$0xff]  ;;  %v273_v61 = vld [vmem:[#allocation2 + $0x60] sm:$0xff]  ;;  %v266_v62 = vld [vmem:[#allocation2 + $0x28] sm:$0xff]  ;;  %vm572_vm13 = vcmp.lt.s32.totalorder %v538_v14, %v1294_v8  ;;  %v540_v22 = vadd.s32 32, %v536_v5  ;;  %vm580_vm15 = vcmp.lt.s32.totalorder %v546_v16, %v1294_v8  ;;  %v548_v24 = vadd.s32 96, %v536_v5 }
  0xf2   :  { %v274_v63 = vld [vmem:[#allocation2 + $0x68] sm:$0xff]  ;;  %v267_v0 = vld [vmem:[#allocation2 + $0x30] sm:$0xff]  ;;  %v268_v2 = vld [vmem:[#allocation2 + $0x38] sm:$0xff]  ;;  %v543_v26 = vadd.s32 56, %v536_v5  ;;  %v551_v28 = vadd.s32 120, %v536_v5  ;;  %v542_v30 = vadd.s32 48, %v536_v5 }
  0xf3   :  { %912 = vmatpush3.xpose.msk.msra.mxu0 %vm293_vm1, %v290_v38  ;;  %989 = vmatpush3.xpose.msk.msra.mxu1 %vm293_vm1, %v290_v38  ;;  %v275_v1 = vld [vmem:[#allocation2 + $0x70] sm:$0xff]  ;;  %v276_v3 = vld [vmem:[#allocation2 + $0x78] sm:$0xff]  ;;  %vm1306_vm6 = vmand %vm571_vm2, %vm1298_vm3  ;;  %v550_v32 = vadd.s32 112, %v536_v5  ;;  %v1030_v40 = vmov 0.0  }
  0xf4   :  { %913 = vmatprep.subr.msk.mxu0 %vm293_vm1, %v289_v41  ;;  %974 = vmatprep.subr.msk.mxu1 %vm293_vm1, %v289_v41  ;;  %vm1313_vm8 = vmand %vm579_vm4, %vm1298_vm3  ;;  %vm583_vm4 = vcmp.lt.s32.totalorder %v549_v20, %v1294_v8 }
  0xf5   :  { %vm1320_vm10 = vmand %vm570_vm5, %vm1298_vm3 }
  0xf6   :  { %vm1327_vm12 = vmand %vm578_vm7, %vm1298_vm3  ;;  %vm574_vm7 = vcmp.lt.s32.totalorder %v540_v22, %v1294_v8 }
  0xf7   :  { %914 = vmatpush3.xpose.msk.msra.mxu0 %vm293_vm1, %v289_v41  ;;  %990 = vmatpush3.xpose.msk.msra.mxu1 %vm293_vm1, %v289_v41  ;;  %vm1334_vm14 = vmand %vm573_vm9, %vm1298_vm3 }
  0xf8   :  { %915 = vmatprep.subr.msk.mxu0 %vm293_vm1, %v288_v42  ;;  %975 = vmatprep.subr.msk.mxu1 %vm293_vm1, %v288_v42  ;;  %vm1341_vm0 = vmand %vm581_vm11, %vm1298_vm3  ;;  %vm582_vm11 = vcmp.lt.s32.totalorder %v548_v24, %v1294_v8 }
  0xf9   :  { %v1493_v25 = vsel %vm1341_vm0, 4294967295, %v1492_v25  ;;  %vm1348_vm2 = vmand %vm572_vm13, %vm1298_vm3 }
  0xfa   :  { %v1495_v27 = vsel %vm1348_vm2, 4294967295, %v1494_v27  ;;  %vm1355_vm5 = vmand %vm580_vm15, %vm1298_vm3  ;;  %vm576_vm15 = vcmp.lt.s32.totalorder %v542_v30, %v1294_v8 }
  0xfb   :  { %916 = vmatpush3.xpose.msk.msra.mxu0 %vm293_vm1, %v288_v42  ;;  %991 = vmatpush3.xpose.msk.msra.mxu1 %vm293_vm1, %v288_v42  ;;  %v1497_v29 = vsel %vm1355_vm5, 4294967295, %v1496_v29  ;;  %vm1369_vm13 = vmand %vm583_vm4, %vm1298_vm3 }
  0xfc   :  { %917 = vmatprep.subr.msk.mxu0 %vm293_vm1, %v287_v43  ;;  %976 = vmatprep.subr.msk.mxu1 %vm293_vm1, %v287_v43  ;;  %vm1385_vm4 = vmand %vm582_vm11, %vm1298_vm3 }
  0xff   :  { %918 = vmatpush3.xpose.msk.msra.mxu0 %vm293_vm1, %v287_v43  ;;  %992 = vmatpush3.xpose.msk.msra.mxu1 %vm293_vm1, %v287_v43 }
 0x100   :  { %919 = vmatprep.subr.msk.mxu0 %vm293_vm1, %v286_v44  ;;  %977 = vmatprep.subr.msk.mxu1 %vm293_vm1, %v286_v44 }
 0x103   :  { %920 = vmatpush3.xpose.msk.msra.mxu0 %vm293_vm1, %v286_v44  ;;  %993 = vmatpush3.xpose.msk.msra.mxu1 %vm293_vm1, %v286_v44 }
 0x104   :  { %921 = vmatprep.subr.msk.mxu0 %vm293_vm1, %v285_v45  ;;  %978 = vmatprep.subr.msk.mxu1 %vm293_vm1, %v285_v45 }
 0x107   :  { %922 = vmatpush3.xpose.msk.msra.mxu0 %vm293_vm1, %v285_v45  ;;  %994 = vmatpush3.xpose.msk.msra.mxu1 %vm293_vm1, %v285_v45 }
 0x108   :  { %923 = vmatprep.subr.msk.mxu0 %vm293_vm1, %v284_v46  ;;  %979 = vmatprep.subr.msk.mxu1 %vm293_vm1, %v284_v46 }
 0x10b   :  { %924 = vmatpush3.xpose.msk.msra.mxu0 %vm293_vm1, %v284_v46  ;;  %995 = vmatpush3.xpose.msk.msra.mxu1 %vm293_vm1, %v284_v46 }
 0x10c   :  { %925 = vmatprep.subr.msk.mxu0 %vm293_vm1, %v283_v47  ;;  %980 = vmatprep.subr.msk.mxu1 %vm293_vm1, %v283_v47 }
 0x10f   :  { %926 = vmatpush3.xpose.msk.msra.mxu0 %vm293_vm1, %v283_v47  ;;  %996 = vmatpush3.xpose.msk.msra.mxu1 %vm293_vm1, %v283_v47 }
 0x110   :  { %927 = vmatprep.subr.msk.mxu0 %vm293_vm1, %v282_v48  ;;  %981 = vmatprep.subr.msk.mxu1 %vm293_vm1, %v282_v48 }
 0x113   :  { %928 = vmatpush3.xpose.msk.msra.mxu0 %vm293_vm1, %v282_v48  ;;  %997 = vmatpush3.xpose.msk.msra.mxu1 %vm293_vm1, %v282_v48 }
 0x114   :  { %929 = vmatprep.subr.msk.mxu0 %vm293_vm1, %v281_v49  ;;  %982 = vmatprep.subr.msk.mxu1 %vm293_vm1, %v281_v49 }
 0x117   :  { %930 = vmatpush3.xpose.msk.msra.mxu0 %vm293_vm1, %v281_v49  ;;  %998 = vmatpush3.xpose.msk.msra.mxu1 %vm293_vm1, %v281_v49 }
 0x118   :  { %931 = vmatprep.subr.msk.mxu0 %vm293_vm1, %v280_v50  ;;  %983 = vmatprep.subr.msk.mxu1 %vm293_vm1, %v280_v50 }
 0x11b   :  { %932 = vmatpush3.xpose.msk.msra.mxu0 %vm293_vm1, %v280_v50  ;;  %999 = vmatpush3.xpose.msk.msra.mxu1 %vm293_vm1, %v280_v50 }
 0x11c   :  { %933 = vmatprep.subr.msk.mxu0 %vm293_vm1, %v279_v51  ;;  %984 = vmatprep.subr.msk.mxu1 %vm293_vm1, %v279_v51 }
 0x11f   :  { %934 = vmatpush3.xpose.msk.msra.mxu0 %vm293_vm1, %v279_v51  ;;  %1000 = vmatpush3.xpose.msk.msra.mxu1 %vm293_vm1, %v279_v51 }
 0x120   :  { %935 = vmatprep.subr.msk.mxu0 %vm293_vm1, %v278_v52  ;;  %985 = vmatprep.subr.msk.mxu1 %vm293_vm1, %v278_v52 }
 0x123   :  { %936 = vmatpush3.xpose.msk.msra.mxu0 %vm293_vm1, %v278_v52  ;;  %1001 = vmatpush3.xpose.msk.msra.mxu1 %vm293_vm1, %v278_v52  ;;  %v1515_v52 = vmov 0 }
 0x124   :  { %937 = vmatprep.subr.msk.mxu0 %vm293_vm1, %v277_v53  ;;  %986 = vmatprep.subr.msk.mxu1 %vm293_vm1, %v277_v53 }
 0x127   :  { %938 = vmatpush3.xpose.msk.msra.mxu0 %vm293_vm1, %v277_v53  ;;  %1002 = vmatpush3.xpose.msk.msra.mxu1 %vm293_vm1, %v277_v53 }
 0x12a   :  { %940 = vmatmul.mubr.msk.f32.vlgmr.msra.gmra.mxu0 %vm293_vm1, %v262_v54  ;;  %952 = vmatmul.mubr.msk.f32.vlgmr.msra.gmra.mxu1 %vm293_vm1, %v270_v55 }
 0x12b   :  { %942 = vmatprep.mubr.msk.f32.mxu0 %vm293_vm1, %v263_v56  ;;  %954 = vmatprep.mubr.msk.f32.mxu1 %vm293_vm1, %v271_v57 }
 0x12e   :  { %943 = vmatmul.mubr.msk.f32.gmra.mxu0 %vm293_vm1, %v264_v58  ;;  %955 = vmatmul.mubr.msk.f32.gmra.mxu1 %vm293_vm1, %v272_v59 }
 0x12f   :  { %945 = vmatprep.mubr.msk.f32.mxu0 %vm293_vm1, %v265_v60  ;;  %957 = vmatprep.mubr.msk.f32.mxu1 %vm293_vm1, %v273_v61 }
 0x132   :  { %946 = vmatmul.mubr.msk.f32.gmra.mxu0 %vm293_vm1, %v266_v62  ;;  %958 = vmatmul.mubr.msk.f32.gmra.mxu1 %vm293_vm1, %v274_v63 }
 0x133   :  { %948 = vmatprep.mubr.msk.f32.mxu0 %vm293_vm1, %v267_v0  ;;  %960 = vmatprep.mubr.msk.f32.mxu1 %vm293_vm1, %v275_v1 }
 0x136   :  { %949 = vmatmul.mubr.msk.f32.gmra.mxu0 %vm293_vm1, %v268_v2  ;;  %961 = vmatmul.mubr.msk.f32.gmra.mxu1 %vm293_vm1, %v276_v3  ;;  %vm575_vm1 = vcmp.lt.s32.totalorder %v541_v18, %v1294_v8 }
 0x137   :  { %vm1362_vm9 = vmand %vm575_vm1, %vm1298_vm3 }
 0x138   :  { %v1499_v31 = vsel %vm1362_vm9, 4294967295, %v1498_v31  ;;  %vm1376_vm1 = vmand %vm574_vm7, %vm1298_vm3 }
 0x139   :  { %v1503_v36 = vsel %vm1376_vm1, 4294967295, %v1502_v36 }
 0x1ea   :  { %v941_v33 = vpop.f32.mrf.mxu0  ;;  %v953_v34 = vpop.f32.mrf.mxu1 }
 0x1eb   :  { %vm642_vm5 = vcmp.gt.f32.partialorder %v941_v33, 0.0  ;;  %vm650_vm2 = vcmp.gt.f32.partialorder %v953_v34, 0.0 }
 0x1ec   :  { %vm658_vm0 = vmand %vm1306_vm6, %vm642_vm5  ;;  %v456_v37 = vpop.f32.mrf.mxu0  ;;  %v496_v38 = vpop.f32.mrf.mxu1  ;;  %vm1506_vm6 = vcmp.lt.s32.totalorder %v543_v26, %v1294_v8 }
 0x1ed   :  { %v808_v41 = vsel %vm658_vm0, 1.0, %v1030_v40  ;;  %vm666_vm7 = vmand %vm1313_vm8, %vm650_vm2  ;;  %vm641_vm9 = vcmp.gt.f32.partialorder %v456_v37, 0.0  ;;  %vm649_vm1 = vcmp.gt.f32.partialorder %v496_v38, 0.0  ;;  %vm1509_vm8 = vcmp.lt.s32.totalorder %v551_v28, %v1294_v8 }
 0x1ee   :  { %vm1397_vm5 = vmand %vm1506_vm6, %vm1298_vm3  ;;  %706 = vst [vmem:[#allocation5 + $0x8] sm:$0xff] %v808_v41  ;;  %v816_v43 = vsel %vm666_vm7, 1.0, %v1030_v40  ;;  %v944_v44 = vpop.f32.mrf.mxu0  ;;  %v956_v45 = vpop.f32.mrf.mxu1 }
 0x1ef   :  { %vm657_vm0 = vmand %vm1320_vm10, %vm641_vm9  ;;  %714 = vst [vmem:[#allocation5 + $0x48] sm:$0xff] %v816_v43  ;;  %vm644_vm7 = vcmp.gt.f32.partialorder %v944_v44, 0.0  ;;  %vm652_vm11 = vcmp.gt.f32.partialorder %v956_v45, 0.0 }
 0x1f0   :  { %vm1409_vm2 = vmand %vm1509_vm8, %vm1298_vm3  ;;  %v807_v47 = vsel %vm657_vm0, 1.0, %v1030_v40  ;;  %v466_v50 = vpop.f32.mrf.mxu0  ;;  %v506_v51 = vpop.f32.mrf.mxu1 }
 0x1f1   :  { %vm665_vm6 = vmand %vm1327_vm12, %vm649_vm1  ;;  %705 = vst [vmem:[#allocation5] sm:$0xff] %v807_v47  ;;  %vm1514_vm12 = vcmp.lt.s32.totalorder %v550_v32, %v1294_v8  ;;  %vm643_vm8 = vcmp.gt.f32.partialorder %v466_v50, 0.0 }
 0x1f2   :  { %vm1420_vm10 = vmand %vm576_vm15, %vm1298_vm3  ;;  %v815_v49 = vsel %vm665_vm6, 1.0, %v1030_v40  ;;  %vm1517_vm15 = vnez %v1493_v25  ;;  %vm651_vm6 = vcmp.gt.f32.partialorder %v506_v51, 0.0  ;;  %v947_v55 = vpop.f32.mrf.mxu0  ;;  %v959_v56 = vpop.f32.mrf.mxu1 }
 0x1f3   :  { %vm660_vm9 = vmand %vm1334_vm14, %vm644_vm7  ;;  %713 = vst [vmem:[#allocation5 + $0x40] sm:$0xff] %v815_v49  ;;  %vm1518_vm14 = vnez %v1495_v27 }
 0x1f4   :  { %vm1431_vm1 = vmand %vm1514_vm12, %vm1298_vm3  ;;  %v810_v53 = vsel %vm660_vm9, 1.0, %v1030_v40  ;;  %vm1519_vm3 = vnez %v1497_v29  ;;  %vm646_vm9 = vcmp.gt.f32.partialorder %v947_v55, 0.0  ;;  %v476_v59 = vpop.f32.mrf.mxu0  ;;  %v516_v60 = vpop.f32.mrf.mxu1 }
 0x1f5   :  { %v1516_v52 = vsel %vm1431_vm1, 4294967295, %v1515_v52  ;;  %vm668_vm0 = vmand %vm1517_vm15, %vm652_vm11  ;;  %708 = vst [vmem:[#allocation5 + $0x18] sm:$0xff] %v810_v53  ;;  %vm654_vm1 = vcmp.gt.f32.partialorder %v959_v56, 0.0  ;;  %vm1520_vm11 = vnez %v1499_v31 }
 0x1f6   :  { %v818_v54 = vsel %vm668_vm0, 1.0, %v1030_v40  ;;  %vm659_vm7 = vmand %vm1518_vm14, %vm643_vm8  ;;  %vm645_vm8 = vcmp.gt.f32.partialorder %v476_v59, 0.0  ;;  %vm653_vm14 = vcmp.gt.f32.partialorder %v516_v60, 0.0  ;;  %v950_v63 = vpop.f32.mrf.mxu0  ;;  %v962_v0 = vpop.f32.mrf.mxu1 }
 0x1f7   :  { %716 = vst [vmem:[#allocation5 + $0x58] sm:$0xff] %v818_v54  ;;  %v809_v57 = vsel %vm659_vm7, 1.0, %v1030_v40  ;;  %vm667_vm12 = vmand %vm1519_vm3, %vm651_vm6  ;;  %vm1521_vm6 = vnez %v1503_v36 }
 0x1f8   :  { %707 = vst [vmem:[#allocation5 + $0x10] sm:$0xff] %v809_v57  ;;  %v817_v58 = vsel %vm667_vm12, 1.0, %v1030_v40  ;;  %vm662_vm15 = vmand %vm1520_vm11, %vm646_vm9  ;;  %vm648_vm12 = vcmp.gt.f32.partialorder %v950_v63, 0.0  ;;  %vm656_vm9 = vcmp.gt.f32.partialorder %v962_v0, 0.0  ;;  %v486_v3 = vpop.f32.mrf.mxu0  ;;  %v526_v4 = vpop.f32.mrf.mxu1 }
 0x1f9   :  { %715 = vst [vmem:[#allocation5 + $0x50] sm:$0xff] %v817_v58  ;;  %v812_v61 = vsel %vm662_vm15, 1.0, %v1030_v40  ;;  %vm670_vm0 = vmand %vm1369_vm13, %vm654_vm1  ;;  %vm647_vm11 = vcmp.gt.f32.partialorder %v486_v3, 0.0  ;;  %vm655_vm15 = vcmp.gt.f32.partialorder %v526_v4, 0.0 }
 0x1fa   :  { %710 = vst [vmem:[#allocation5 + $0x28] sm:$0xff] %v812_v61  ;;  %v820_v62 = vsel %vm670_vm0, 1.0, %v1030_v40  ;;  %vm661_vm7 = vmand %vm1521_vm6, %vm645_vm8 }
 0x1fb   :  { %718 = vst [vmem:[#allocation5 + $0x68] sm:$0xff] %v820_v62  ;;  %v811_v1 = vsel %vm661_vm7, 1.0, %v1030_v40  ;;  %vm669_vm3 = vmand %vm1385_vm4, %vm653_vm14 }
 0x1fc   :  { %709 = vst [vmem:[#allocation5 + $0x20] sm:$0xff] %v811_v1  ;;  %v819_v2 = vsel %vm669_vm3, 1.0, %v1030_v40  ;;  %vm664_vm13 = vmand %vm1397_vm5, %vm648_vm12  ;;  %vm1522_vm5 = vnez %v1516_v52 }
 0x1fd   :  { %717 = vst [vmem:[#allocation5 + $0x60] sm:$0xff] %v819_v2  ;;  %v814_v5 = vsel %vm664_vm13, 1.0, %v1030_v40  ;;  %vm672_vm1 = vmand %vm1409_vm2, %vm656_vm9 }
 0x1fe   :  { %712 = vst [vmem:[#allocation5 + $0x38] sm:$0xff] %v814_v5  ;;  %v822_v6 = vsel %vm672_vm1, 1.0, %v1030_v40  ;;  %vm663_vm4 = vmand %vm1420_vm10, %vm647_vm11 }
 0x1ff   :  { %720 = vst [vmem:[#allocation5 + $0x78] sm:$0xff] %v822_v6  ;;  %v813_v7 = vsel %vm663_vm4, 1.0, %v1030_v40  ;;  %vm671_vm0 = vmand %vm1522_vm5, %vm655_vm15 }
 0x200   :  { %711 = vst [vmem:[#allocation5 + $0x30] sm:$0xff] %v813_v7  ;;  %v821_v8 = vsel %vm671_vm0, 1.0, %v1030_v40 }
 0x201   :  { %719 = vst [vmem:[#allocation5 + $0x70] sm:$0xff] %v821_v8 }
 0x202 PF:  { %723 = sbr.rel (!%p1063_p1) target bundleno = 523 (0x20b), region = 25  ;;  %v1031_v9 = vmov (%p1063_p1), 0.0  }
 0x203   :  { %724 = vst [vmem:[#allocation5] sm:$0xff] (%p1063_p1), %v1031_v9  ;;  %725 = vst [vmem:[#allocation5 + $0x8] sm:$0xff] (%p1063_p1), %v1031_v9 }
 0x204   :  { %726 = vst [vmem:[#allocation5 + $0x10] sm:$0xff] (%p1063_p1), %v1031_v9  ;;  %727 = vst [vmem:[#allocation5 + $0x18] sm:$0xff] (%p1063_p1), %v1031_v9 }
 0x205   :  { %728 = vst [vmem:[#allocation5 + $0x20] sm:$0xff] (%p1063_p1), %v1031_v9  ;;  %729 = vst [vmem:[#allocation5 + $0x28] sm:$0xff] (%p1063_p1), %v1031_v9 }
 0x206   :  { %730 = vst [vmem:[#allocation5 + $0x30] sm:$0xff] (%p1063_p1), %v1031_v9  ;;  %731 = vst [vmem:[#allocation5 + $0x38] sm:$0xff] (%p1063_p1), %v1031_v9 }
 0x207   :  { %732 = vst [vmem:[#allocation5 + $0x40] sm:$0xff] %v1031_v9  ;;  %733 = vst [vmem:[#allocation5 + $0x48] sm:$0xff] %v1031_v9 }
 0x208   :  { %734 = vst [vmem:[#allocation5 + $0x50] sm:$0xff] %v1031_v9  ;;  %735 = vst [vmem:[#allocation5 + $0x58] sm:$0xff] %v1031_v9 }
 0x209   :  { %736 = vst [vmem:[#allocation5 + $0x60] sm:$0xff] %v1031_v9  ;;  %737 = vst [vmem:[#allocation5 + $0x68] sm:$0xff] %v1031_v9 }
 0x20a   :  { %738 = vst [vmem:[#allocation5 + $0x70] sm:$0xff] %v1031_v9  ;;  %739 = vst [vmem:[#allocation5 + $0x78] sm:$0xff] %v1031_v9 }
 0x20b PF:  { %s1032_s0 = smov [#allocation5]  }
 0x20c   :  { %s745_s17 = sshll.u32 %s1032_s0, 4  ;;  %s746_s17 = int_to_ptr.vmem [resolvable:$true] %s745_s17 }
 0x20d   :  { %s1008_s10 = scalar_lea.vmem %s746_s17, 2048  ;;  %p1013_p3 = scmp.lt.s32.totalorder %s746_s17, %s746_s17 }
 0x20e   :  { %p1009_p2 = scmp.ne.s32.totalorder %s746_s17, %s1008_s10  ;;  %p1014_p4 = scmp.lt.s32.totalorder %s1008_s10, %s1008_s10 }
 0x210   :  { %p1015_p5 = por %p1014_p4, %p1013_p3 }
 0x212   :  { %p1016_p6 = pnand %p1015_p5, %p1009_p2 }
 0x214   :  { %1019 = shalt.err (!%p1016_p6)
}
 0x215   :  { %s1033_s11 = smov 128   ;;  %s1034_s12 = smov 8  }
 0x216   :  { %751 = dma.vmem_to_hbm [thread:$0]  %s746_s17, 2048, %s1478_s4, [#allocation6], %s1033_s11, %s1033_s11, %s1034_s12  }
 0x217   :  { %1028 = dma.done.wait [#allocation6], 2048  }
 0x218   :  { %1029 = vsyncadd [#allocation6], 4294965248 }
 0x219   :  { %755 = vsyncpa [#allocation6], 1 }

</bundles_post_ra>
